<compile_context>
chip_gen: v5e
topology: v5e:2x2
jax: 0.10.0
libtpu: 0.0.40
codegen_flags: <defaults>
</compile_context>

<pallas_src>
import functools

import jax
import jax.numpy as jnp
from jax import lax
from jax.experimental import pallas as pl
from jax.experimental.pallas import tpu as pltpu

LANES = 128
SUBLANES = 8
MIN_CHUNK = SUBLANES * LANES   # 1024: bulk/tail split unit (one f32 vreg row-slab)
GROUP_ROWS = 128               # rows per in-kernel accumulate group (16 vregs/stream)


def _chip_config():
    """(num_chunks, sum_block_rows, none_block_rows, vmem_limit_bytes)."""
    try:
        kind = jax.devices()[0].device_kind.lower()
    except Exception:
        kind = ""
    if "7" in kind:
        # v7x: 2 TensorCores, ~3.2 TB/s per TC -> 4 MiB blocks + 2-way chunk split.
        # sum path: 2 streams x 2 bufs x 4 MiB = 16 MiB; 'none': 24 MiB (< 32 default).
        return 2, 8192, 8192, 48 * 1024 * 1024
    # v5e / v6e: single TensorCore -> no chunk split; 2 MiB blocks.
    # sum path 8 MiB resident, 'none' path 12 MiB -> fits v5e's 16 MiB default.
    return 1, 4096, 4096, None


def _pinball(z, quantile):
    q = jnp.float32(quantile)
    # max(q*z, (q-1)*z) == where(z > 0, q*z, (q-1)*z): 3 VALU ops/elem.
    return jnp.maximum(q * z, (q - 1.0) * z)


def _block_partial_sum(pred_ref, target_ref, *, quantile, block_rows, group_rows,
                       mask_row0=None, total_rows=None):
    """(8,128) f32 partial sum of the pinball loss over one input block.

    Processes the block in row groups so intermediates stay in vregs (fused
    load -> pinball -> add; no VMEM materialization of the full block).  When
    `mask_row0` is given, rows whose global index (mask_row0 + local row) is
    >= total_rows are zeroed via a select, squashing any OOB NaN/Inf garbage.
    """
    def group_sum(r0, nrows):
        z = (target_ref[pl.ds(r0, nrows), :].astype(jnp.float32)
             - pred_ref[pl.ds(r0, nrows), :].astype(jnp.float32))
        loss = _pinball(z, quantile)
        if mask_row0 is not None:
            rid = mask_row0 + r0 + lax.broadcasted_iota(jnp.int32, loss.shape, 0)
            loss = jnp.where(rid < total_rows, loss, 0.0)
        # (nrows,128) -> (nrows//8, 8, 128) sum over leading axis: pure VALU
        # vreg adds, no per-step cross-lane (XLU) reduction.
        return jnp.sum(loss.reshape(-1, SUBLANES, LANES), axis=0)

    n_full = block_rows // group_rows
    rem = block_rows % group_rows            # multiple of 8 (both operands are)
    acc = jnp.zeros((SUBLANES, LANES), jnp.float32)
    if n_full > 0:
        def body(g, a):
            r0 = pl.multiple_of(g * group_rows, group_rows)
            return a + group_sum(r0, group_rows)
        acc = lax.fori_loop(0, n_full, body, acc,
                            unroll=n_full if n_full <= 8 else 8)
    if rem:
        acc = acc + group_sum(n_full * group_rows, rem)
    return acc


# ---------------------------------------------------------------------------
# Reducing kernel (sum / mean): accumulates directly into the resident out_ref
# block (its index depends only on the chunk axis c, so it lives in VMEM across
# the whole reduction axis j).  Final cross-lane reduce + 1/n happens in JAX.
# ---------------------------------------------------------------------------
def _quantile_sum_kernel(pred_ref, target_ref, out_ref, *, quantile, block_rows,
                         group_rows, blocks_per_chunk, total_rows, needs_mask):
    c = pl.program_id(0)
    j = pl.program_id(1)

    @pl.when(j == 0)
    def _():
        out_ref[...] = jnp.zeros_like(out_ref)

    if not needs_mask:
        out_ref[0] += _block_partial_sum(
            pred_ref, target_ref, quantile=quantile,
            block_rows=block_rows, group_rows=group_rows)
    else:
        # Unclamped (intended) block index.  The DMA index_map clamps it so the
        # copy never goes OOB; rows past total_rows must not contribute.
        block_idx = c * blocks_per_chunk + j
        is_interior = (block_idx + 1) * block_rows <= total_rows

        @pl.when(is_interior)
        def _():
            # Fast path: no iota/cmp/select on interior blocks.
            out_ref[0] += _block_partial_sum(
                pred_ref, target_ref, quantile=quantile,
                block_rows=block_rows, group_rows=group_rows)

        @pl.when(jnp.logical_not(is_interior))
        def _():
            # Boundary block (partial trailing) or clamped duplicate block
            # (fully masked -> contributes exactly 0).
            out_ref[0] += _block_partial_sum(
                pred_ref, target_ref, quantile=quantile,
                block_rows=block_rows, group_rows=group_rows,
                mask_row0=block_idx * block_rows, total_rows=total_rows)


# ---------------------------------------------------------------------------
# Elementwise kernel (reduction='none'): per-element pinball loss, written in
# row groups so intermediates never materialize block-sized VMEM buffers.
# ---------------------------------------------------------------------------
def _quantile_elemwise_kernel(pred_ref, target_ref, out_ref, *, quantile,
                              block_rows, group_rows):
    def write(r0, nrows):
        z = (target_ref[pl.ds(r0, nrows), :].astype(jnp.float32)
             - pred_ref[pl.ds(r0, nrows), :].astype(jnp.float32))
        out_ref[pl.ds(r0, nrows), :] = _pinball(z, quantile).astype(out_ref.dtype)

    n_full = block_rows // group_rows
    rem = block_rows % group_rows
    if n_full > 0:
        def body(g, carry):
            r0 = pl.multiple_of(g * group_rows, group_rows)
            write(r0, group_rows)
            return carry
        lax.fori_loop(0, n_full, body, 0, unroll=n_full if n_full <= 8 else 8)
    if rem:
        write(n_full * group_rows, rem)


def _tail_pinball(pred_flat, target_flat, bulk_n, quantile):
    """Plain-JAX pinball for the <1024-element tail (avoids padding the bulk)."""
    z = (target_flat[bulk_n:].astype(jnp.float32)
         - pred_flat[bulk_n:].astype(jnp.float32))
    return _pinball(z, quantile)


def quantile_loss(pred, target, *, quantile=0.25, reduction='mean'):
    """JAX/Pallas equivalent of QuantileLoss.forward."""
    if reduction not in ('mean', 'sum', 'none'):
        raise ValueError(
            f"Invalid reduction mode: {reduction}. Choose from 'mean', 'sum', or 'none'.")

    out_dtype = jnp.result_type(pred.dtype, target.dtype)
    orig_shape = pred.shape
    n = pred.size
    pred_flat = pred.reshape(-1)
    target_flat = target.reshape(-1)
    bulk_n = (n // MIN_CHUNK) * MIN_CHUNK
    tail_n = n - bulk_n

    num_chunks_cfg, sum_rows_cfg, none_rows_cfg, vmem_limit = _chip_config()

    # ---- reduction='none' --------------------------------------------------
    if reduction == 'none':
        if n == 0:
            return jnp.zeros(orig_shape, out_dtype)
        parts = []
        if bulk_n:
            rows = bulk_n // LANES                       # multiple of 8
            pred2d = pred_flat[:bulk_n].reshape(rows, LANES)
            target2d = target_flat[:bulk_n].reshape(rows, LANES)
            block_rows = min(none_rows_cfg, rows)
            group_rows = min(GROUP_ROWS, block_rows)
            num_blocks = pl.cdiv(rows, block_rows)
            bulk_out = pl.pallas_call(
                functools.partial(_quantile_elemwise_kernel, quantile=quantile,
                                  block_rows=block_rows, group_rows=group_rows),
                out_shape=jax.ShapeDtypeStruct((rows, LANES), out_dtype),
                grid_spec=pltpu.PrefetchScalarGridSpec(
                    num_scalar_prefetch=0,
                    grid=(num_blocks,),
                    in_specs=[pl.BlockSpec((block_rows, LANES), lambda i: (i, 0)),
                              pl.BlockSpec((block_rows, LANES), lambda i: (i, 0))],
                    out_specs=pl.BlockSpec((block_rows, LANES), lambda i: (i, 0)),
                ),
                compiler_params=pltpu.CompilerParams(
                    dimension_semantics=("parallel",),
                    vmem_limit_bytes=vmem_limit),
            )(pred2d, target2d)
            parts.append(bulk_out.reshape(-1))
        if tail_n:
            parts.append(_tail_pinball(pred_flat, target_flat, bulk_n,
                                       quantile).astype(out_dtype))
        out = parts[0] if len(parts) == 1 else jnp.concatenate(parts)
        return out.reshape(orig_shape)

    # ---- sum / mean ---------------------------------------------------------
    total = jnp.zeros((), jnp.float32)
    if bulk_n:
        rows = bulk_n // LANES                           # multiple of 8
        pred2d = pred_flat[:bulk_n].reshape(rows, LANES)
        target2d = target_flat[:bulk_n].reshape(rows, LANES)
        block_rows = min(sum_rows_cfg, rows)
        group_rows = min(GROUP_ROWS, block_rows)
        num_blocks = pl.cdiv(rows, block_rows)
        num_chunks = min(num_chunks_cfg, num_blocks)
        blocks_per_chunk = pl.cdiv(num_blocks, num_chunks)
        needs_clamp = num_chunks * blocks_per_chunk != num_blocks
        needs_mask = (rows % block_rows != 0) or needs_clamp

        if needs_clamp:
            def in_map(c, j):
                # Clamp so the DMA never indexes past the array; masked in-kernel.
                return (jnp.minimum(c * blocks_per_chunk + j, num_blocks - 1), 0)
        else:
            def in_map(c, j):
                return (c * blocks_per_chunk + j, 0)

        # TODO(synk): confirm on a v7x trace that the outer "parallel" chunk axis
        # shards across both TensorCores; switch to pltpu.CORE_PARALLEL if not.
        partials = pl.pallas_call(
            functools.partial(_quantile_sum_kernel, quantile=quantile,
                              block_rows=block_rows, group_rows=group_rows,
                              blocks_per_chunk=blocks_per_chunk,
                              total_rows=rows, needs_mask=needs_mask),
            out_shape=jax.ShapeDtypeStruct((num_chunks, SUBLANES, LANES),
                                           jnp.float32),
            grid_spec=pltpu.PrefetchScalarGridSpec(
                num_scalar_prefetch=0,
                grid=(num_chunks, blocks_per_chunk),
                in_specs=[pl.BlockSpec((block_rows, LANES), in_map),
                          pl.BlockSpec((block_rows, LANES), in_map)],
                out_specs=pl.BlockSpec((1, SUBLANES, LANES),
                                       lambda c, j: (c, 0, 0)),
            ),
            compiler_params=pltpu.CompilerParams(
                dimension_semantics=("parallel", "arbitrary"),
                vmem_limit_bytes=vmem_limit),
        )(pred2d, target2d)
        total = total + jnp.sum(partials)                # tiny follow-up reduce
    if tail_n:
        total = total + jnp.sum(_tail_pinball(pred_flat, target_flat, bulk_n,
                                              quantile))
    if reduction == 'mean':
        total = total / jnp.float32(max(n, 1))
    return total.astype(out_dtype)


# ---------------------------------------------------------------------------
# Reference + checks
# ---------------------------------------------------------------------------
def _reference(pred, target, quantile, reduction):
    z = target.astype(jnp.float32) - pred.astype(jnp.float32)
    loss = jnp.where(z > 0, quantile * z, (quantile - 1.0) * z)
    if reduction == 'mean':
        return loss.mean()
    if reduction == 'sum':
        return loss.sum()
    return loss


def _check(pred, target, quantile):
    out_mean = quantile_loss(pred, target, quantile=quantile, reduction='mean')
    jax.block_until_ready(out_mean)
    ref_mean = _reference(pred, target, quantile, 'mean')
    assert jnp.allclose(out_mean, ref_mean, rtol=1e-5, atol=1e-5), \
        (out_mean, ref_mean)

    out_sum = quantile_loss(pred, target, quantile=quantile, reduction='sum')
    jax.block_until_ready(out_sum)
    ref_sum = _reference(pred, target, quantile, 'sum')
    assert jnp.allclose(out_sum, ref_sum, rtol=1e-5, atol=1e-3), \
        (out_sum, ref_sum)

    out_none = quantile_loss(pred, target, quantile=quantile, reduction='none')
    jax.block_until_ready(out_none)
    ref_none = _reference(pred, target, quantile, 'none')
    assert out_none.shape == pred.shape
    assert jnp.allclose(out_none.astype(jnp.float32), ref_none,
                        rtol=1e-5, atol=1e-5)


if __name__ == "__main__":
    key = jax.random.PRNGKey(0)
    quantile = 0.25
    k1, k2, k3, k4, k5, k6, k7, k8 = jax.random.split(key, 8)

    # Small regression-style shape [B, C, H, W] (2048 elems, bulk-only path).
    pred = jax.random.normal(k1, (2, 4, 16, 16), dtype=jnp.float32)
    target = jax.random.normal(k2, (2, 4, 16, 16), dtype=jnp.float32)
    _check(pred, target, quantile)

    # Tiny odd size (105 elems) -> pure plain-JAX tail path.
    pred_o = jax.random.normal(k3, (3, 5, 7), dtype=jnp.float32)
    target_o = jax.random.normal(k4, (3, 5, 7), dtype=jnp.float32)
    _check(pred_o, target_o, quantile)

    # Mixed bulk + tail (1105 elems = 1024 kernel bulk + 81 JAX tail).
    pred_t = jax.random.normal(k5, (5, 13, 17), dtype=jnp.float32)
    target_t = jax.random.normal(k6, (5, 13, 17), dtype=jnp.float32)
    _check(pred_t, target_t, quantile)

    # Multi-block with a partial trailing block -> exercises gated masking
    # (and chunk clamping on v7x).
    pred_m = jax.random.normal(k7, (3, 3000, 128), dtype=jnp.float32)
    target_m = jax.random.normal(k8, (3, 3000, 128), dtype=jnp.float32)
    _check(pred_m, target_m, quantile)

    print("KERNEL_OK")
</pallas_src>

<mosaic_0001>
module attributes {stable_mosaic.version = 11 : i64} {
  func.func @_quantile_sum_kernel(%arg0: i32, %arg1: i32, %arg2: memref<16x128xf32, #tpu.memory_space<vmem>>, %arg3: memref<16x128xf32, #tpu.memory_space<vmem>>, %arg4: memref<1x8x128xf32, #tpu.memory_space<vmem>>) attributes {dimension_semantics = [#tpu.dimension_semantics<parallel>, #tpu.dimension_semantics<arbitrary>], iteration_bounds = array<i64: 1, 1>, scalar_prefetch = 0 : i64, scratch_operands = 0 : i64, tpu.core_type = #tpu.core_type<tc>, window_params = [{transform_indices = @transform_0, window_bounds = array<i64: 16, 128>}, {transform_indices = @transform_1, window_bounds = array<i64: 16, 128>}, {transform_indices = @transform_2, window_bounds = array<i64: 1, 8, 128>}]} {
    %c0_i32 = arith.constant 0 : i32
    %0 = arith.cmpi eq, %arg1, %c0_i32 : i32
    %1 = arith.extui %0 : i1 to i32
    %c0_i32_0 = arith.constant 0 : i32
    %2 = arith.cmpi ne, %1, %c0_i32_0 : i32
    scf.if %2 {
      %cst_13 = arith.constant 0.000000e+00 : f32
      %26 = vector.broadcast %cst_13 : f32 to vector<1x8x128xf32>
      %c0_14 = arith.constant 0 : index
      %c0_15 = arith.constant 0 : index
      %c0_16 = arith.constant 0 : index
      %27 = vector.load %arg4[%c0_14, %c0_15, %c0_16] : memref<1x8x128xf32, #tpu.memory_space<vmem>>, vector<1x8x128xf32>
      tpu.vector_store %arg4[%c0_14, %c0_15, %c0_16], %26 {strides = array<i32>} : memref<1x8x128xf32, #tpu.memory_space<vmem>>, vector<1x8x128xf32>,
    } else {
    }
    %c0 = arith.constant 0 : index
    %c0_1 = arith.constant 0 : index
    %c0_2 = arith.constant 0 : index
    %3 = vector.load %arg4[%c0, %c0_1, %c0_2] : memref<1x8x128xf32, #tpu.memory_space<vmem>>, vector<1x8x128xf32>
    %4 = vector.shape_cast %3 : vector<1x8x128xf32> to vector<8x128xf32>
    %cst = arith.constant 0.000000e+00 : f32
    %5 = vector.broadcast %cst : f32 to vector<8x128xf32>
    %c0_i32_3 = arith.constant 0 : i32
    %c16_i32 = arith.constant 16 : i32
    %6 = arith.muli %c0_i32_3, %c16_i32 : i32
    %7 = tpu.assume_multiple %6, 16 : i32
    %8 = arith.index_cast %7 : i32 to index
    %c0_4 = arith.constant 0 : index
    %9 = vector.load %arg3[%8, %c0_4] : memref<16x128xf32, #tpu.memory_space<vmem>>, vector<16x128xf32>
    %10 = arith.index_cast %7 : i32 to index
    %c0_5 = arith.constant 0 : index
    %11 = vector.load %arg2[%10, %c0_5] : memref<16x128xf32, #tpu.memory_space<vmem>>, vector<16x128xf32>
    %12 = arith.subf %9, %11 : vector<16x128xf32>
    %cst_6 = arith.constant 2.500000e-01 : f32
    %13 = vector.broadcast %cst_6 : f32 to vector<16x128xf32>
    %14 = arith.mulf %13, %12 : vector<16x128xf32>
    %cst_7 = arith.constant 2.500000e-01 : f32
    %cst_8 = arith.constant 1.000000e+00 : f32
    %15 = arith.subf %cst_7, %cst_8 : f32
    %16 = vector.broadcast %15 : f32 to vector<16x128xf32>
    %17 = arith.mulf %16, %12 : vector<16x128xf32>
    %18 = arith.maximumf %14, %17 : vector<16x128xf32>
    %19 = vector.shape_cast %18 : vector<16x128xf32> to vector<2x8x128xf32>
    %cst_9 = arith.constant dense<0.000000e+00> : vector<8x128xf32>
    %20 = vector.multi_reduction <add>, %19, %cst_9 [0] : vector<2x8x128xf32> to vector<8x128xf32>
    %21 = arith.addf %5, %20 : vector<8x128xf32>
    %c1_i32 = arith.constant 1 : i32
    %22 = arith.addf %4, %21 : vector<8x128xf32>
    %c0_10 = arith.constant 0 : index
    %c0_11 = arith.constant 0 : index
    %c0_12 = arith.constant 0 : index
    %23 = vector.load %arg4[%c0_10, %c0_11, %c0_12] : memref<1x8x128xf32, #tpu.memory_space<vmem>>, vector<1x8x128xf32>
    %24 = vector.shape_cast %23 : vector<1x8x128xf32> to vector<8x128xf32>
    %25 = vector.shape_cast %22 : vector<8x128xf32> to vector<1x8x128xf32>
    tpu.vector_store %arg4[%c0_10, %c0_11, %c0_12], %25 {strides = array<i32>} : memref<1x8x128xf32, #tpu.memory_space<vmem>>, vector<1x8x128xf32>,
    return
  }
  func.func @transform_0(%arg0: i32, %arg1: i32) -> (i32, i32) {
    %c1_i32 = arith.constant 1 : i32
    %0 = arith.muli %arg0, %c1_i32 : i32
    %1 = arith.addi %0, %arg1 : i32
    %c0_i32 = arith.constant 0 : i32
    %c0_i32_0 = arith.constant 0 : i32
    return %1, %c0_i32 : i32, i32
  }
  func.func @transform_1(%arg0: i32, %arg1: i32) -> (i32, i32) {
    %c1_i32 = arith.constant 1 : i32
    %0 = arith.muli %arg0, %c1_i32 : i32
    %1 = arith.addi %0, %arg1 : i32
    %c0_i32 = arith.constant 0 : i32
    %c0_i32_0 = arith.constant 0 : i32
    return %1, %c0_i32 : i32, i32
  }
  func.func @transform_2(%arg0: i32, %arg1: i32) -> (i32, i32, i32) {
    %c0_i32 = arith.constant 0 : i32
    %c0_i32_0 = arith.constant 0 : i32
    %c0_i32_1 = arith.constant 0 : i32
    return %arg0, %c0_i32, %c0_i32_0 : i32, i32, i32
  }
}

</mosaic_0001>

<bundles_post_ra>
// kernel: tpu_custom_call.1
= control target key start
LH: loop header
LB: loop body
LE: loop exit
PB: predicated region body
PF: predicated region fallthrough
CT: control target
= control target key end

     0   :  { %7 = vsyncpa [#allocation3], 0  ;;  %s209_s0 = inlined_call_operand.hbm [shape: f32[16,128], index: 0, kind: input, shape index: {}]   ;;  %s210_s1 = inlined_call_operand.hbm [shape: f32[16,128], index: 1, kind: input, shape index: {}]   ;;  %s211_s2 = inlined_call_operand.hbm [shape: f32[1,8,128], index: 2, kind: output, shape index: {}]  }
   0x1   :  { %8 = vsyncpa [#allocation6], 0 }
   0x2   :  { %9 = vsyncpa [#allocation4], 0  ;;  %s18_s11 = sshll.u32 %s209_s0, 4  ;;  %s180_s12 = smov [#allocation2]   ;;  %s19_s11 = int_to_ptr.hbm [resolvable:$true] %s18_s11 }
   0x3   :  { %s20_s13 = sshll.u32 %s180_s12, 4  ;;  %s35_s16 = sshll.u32 %s210_s1, 4  ;;  %s21_s13 = int_to_ptr.vmem [resolvable:$true] %s20_s13  ;;  %s36_s16 = int_to_ptr.hbm [resolvable:$true] %s35_s16 }
   0x4   :  { %s181_s17 = smov 128   ;;  %s182_s18 = smov 8  }
   0x5   :  { %26 = dma.hbm_to_vmem [thread:$0]  %s19_s11, 256, %s21_s13, [#allocation3], %s181_s17, %s181_s17, %s182_s18  }
   0x6   :  { %s183_s19 = smov [#allocation5]  }
   0x7   :  { %s37_s20 = sshll.u32 %s183_s19, 4  ;;  %s38_s20 = int_to_ptr.vmem [resolvable:$true] %s37_s20 }
   0x8   :  { %43 = dma.hbm_to_vmem [thread:$0]  %s36_s16, 256, %s38_s20, [#allocation6], %s181_s17, %s181_s17, %s182_s18  }
   0x9   :  { %174 = dma.done.wait [#allocation3], 256  }
   0xa   :  { %175 = vsyncadd [#allocation3], 4294967040 }
   0xb   :  { %176 = dma.done.wait [#allocation6], 256  }
   0xc   :  { %177 = vsyncadd [#allocation6], 4294967040  ;;  %v62_v0 = vld [vmem:[#allocation5] sm:$0xff]  ;;  %v63_v1 = vld [vmem:[#allocation5 + $0x8] sm:$0xff]  ;;  %s184_s0 = smov [#allocation7]   ;;  %s85_s23 = sshll.u32 %s211_s2, 4  ;;  %s86_s23 = int_to_ptr.hbm [resolvable:$true] %s85_s23 }
   0xd   :  { %v64_v2 = vld [vmem:[#allocation2] sm:$0xff]  ;;  %v65_v3 = vld [vmem:[#allocation2 + $0x8] sm:$0xff]  ;;  %s83_s1 = sshll.u32 %s184_s0, 4  ;;  %s84_s1 = int_to_ptr.vmem [resolvable:$true] %s83_s1 }
   0xe   :  { %v66_v4 = vsub.f32 %v62_v0, %v64_v2  ;;  %v67_v5 = vsub.f32 %v63_v1, %v65_v3 }
  0x10   :  { %v68_v6 = vmul.f32 0.25, %v66_v4  ;;  %v70_v7 = vmul.f32 -0.75, %v66_v4  ;;  %v69_v8 = vmul.f32 0.25, %v67_v5  ;;  %v71_v9 = vmul.f32 -0.75, %v67_v5 }
  0x12   :  { %v72_v10 = vmax.f32 %v68_v6, %v70_v7  ;;  %v73_v11 = vmax.f32 %v69_v8, %v71_v9 }
  0x14   :  { %v74_v12 = vadd.f32 %v73_v11, %v72_v10 }
  0x16   :  { %77 = vst [vmem:[#allocation7] sm:$0xff] %v74_v12 }
  0x17   :  { %88 = dma.vmem_to_hbm [thread:$0]  %s84_s1, 128, %s86_s23, [#allocation4]  }
  0x18   :  { %178 = dma.done.wait [#allocation4], 128  }
  0x19   :  { %179 = vsyncadd [#allocation4], 4294967168 }
  0x1a   :  { %93 = vsyncpa [#allocation3], 1 }
  0x1b   :  { %94 = vsyncpa [#allocation6], 1 }
  0x1c   :  { %95 = vsyncpa [#allocation4], 1 }

</bundles_post_ra>
